<compile_context>
chip_gen: v5e
topology: v5e:2x2
jax: 0.10.0
libtpu: 0.0.40
codegen_flags: <defaults>
</compile_context>

<pallas_src>
import jax
import jax.numpy as jnp
from jax.experimental import pallas as pl
from jax.experimental.pallas import tpu as pltpu


def _round_up(x, m):
    return ((x + m - 1) // m) * m


# ----------------------------------------------------------------------------
# Kernels
# ----------------------------------------------------------------------------
def _svd_linear_kernel_fused(x_ref, we_ref, wd_ref, b_ref, o_ref):
    """1-D grid over batch tiles; full output width per step (no h scratch)."""
    h = jnp.dot(x_ref[...], we_ref[...], preferred_element_type=jnp.float32)
    # Feed the decoder MXU at its native input width when weights are bf16.
    if wd_ref.dtype != jnp.float32:
        h = h.astype(wd_ref.dtype)
    y = jnp.dot(h, wd_ref[...], preferred_element_type=jnp.float32)
    o_ref[...] = (y + b_ref[...]).astype(o_ref.dtype)


def _svd_linear_kernel_tiled_n(x_ref, we_ref, wd_ref, b_ref, o_ref, h_ref):
    """2-D grid (batch tile i, out-feature tile j).

    The encoder matmul runs once per batch tile (j == 0) into the VMEM scratch
    and is reused for every decoder N tile.
    NOTE: this REQUIRES axis 1 (j) to remain an innermost, sequentially
    executed ("arbitrary") grid axis — never mark it parallel/core-parallel.
    """
    @pl.when(pl.program_id(1) == 0)
    def _():
        h = jnp.dot(x_ref[...], we_ref[...], preferred_element_type=jnp.float32)
        h_ref[...] = h.astype(h_ref.dtype)

    y = jnp.dot(h_ref[...], wd_ref[...], preferred_element_type=jnp.float32)
    o_ref[...] = (y + b_ref[...]).astype(o_ref.dtype)


# ----------------------------------------------------------------------------
# Parameter preparation (call ONCE at weight-load time)
# ----------------------------------------------------------------------------
def prepare_svd_linear_params(we, wd, b=None):
    """we: [h_dim, in_f], wd: [out_f, h_dim] (PyTorch Linear layout), b: [out_f].

    Returns (we_t [in_f, h_dim], wd_t [h_dim, out_f], b2d [1, out_f] f32) so the
    kernel does plain NN matmuls and no per-call transposes / casts are paid.
    """
    we = jnp.asarray(we)
    wd = jnp.asarray(wd)
    out_f = wd.shape[0]
    we_t = jnp.transpose(we)
    wd_t = jnp.transpose(wd)
    if b is None:
        b2d = jnp.zeros((1, out_f), jnp.float32)
    else:
        b2d = jnp.asarray(b, jnp.float32).reshape(1, out_f)
    return we_t, wd_t, b2d


# ----------------------------------------------------------------------------
# Wrapper
# ----------------------------------------------------------------------------
def svd_linear(x, we_t, wd_t, b2d, *, tm=None, tn=None):
    """y = (x @ we_t) @ wd_t + b  with x: [B, in_f], we_t: [in_f, h_dim],
    wd_t: [h_dim, out_f], b2d: [1, out_f].  Returns [B, out_f] in x.dtype."""
    B, in_f = x.shape
    in_f2, h_dim = we_t.shape
    h_dim2, out_f = wd_t.shape
    assert in_f == in_f2 and h_dim == h_dim2 and b2d.shape == (1, out_f)

    xb = jnp.dtype(x.dtype).itemsize
    wb = jnp.dtype(we_t.dtype).itemsize
    h_dtype = wd_t.dtype if wd_t.dtype == jnp.bfloat16 else jnp.float32
    hb = jnp.dtype(h_dtype).itemsize
    sublane = 16 if x.dtype == jnp.bfloat16 else 8

    # ---- per-chip VMEM budget ----------------------------------------------
    try:
        vmem_cap = pltpu.get_tpu_info().vmem_capacity_bytes
    except Exception:
        vmem_cap = 128 << 20
    budget = max(int(vmem_cap * 0.55), 16 << 20)
    # 64 MiB parts (v7x) -> smaller batch tiles; 128 MiB parts (v5e/v6e) -> 512.
    tm_cap = 256 if vmem_cap <= (64 << 20) else 512

    # Encoder weight is grid-invariant: single-buffer it when large so the
    # freed VMEM buys bigger activation tiles.
    we_bytes = in_f * h_dim * wb
    we_single = we_bytes > (4 << 20)
    we_buf = we_bytes * (1 if we_single else 2)

    def est(tm_, tn_, tiled_n_, wd_single_):
        wd_mult = 1 if (not tiled_n_ and wd_single_) else 2
        return (2 * tm_ * in_f * xb            # x tiles (double-buffered)
                + we_buf                        # encoder weight
                + wd_mult * h_dim * tn_ * wb    # decoder weight
                + 2 * tn_ * 4                   # bias
                + 2 * tm_ * tn_ * xb            # output tiles
                + (tm_ * h_dim * hb if tiled_n_ else 0))  # h scratch

    # ---- N tiling ------------------------------------------------------------
    wd_single_full = (h_dim * out_f * wb) > (4 << 20)
    tm_probe = min(_round_up(B, sublane), tm_cap)
    if tn is None:
        if est(tm_probe, out_f, False, wd_single_full) <= budget:
            tn = out_f  # 1-D grid over batch tiles (preferred)
        else:
            tn = out_f
            for cand in (512, 256, 128):  # 256-multiples for v6e/v7x MXU tiles
                if out_f % cand == 0:
                    tn = cand
                    break
    tiled_n = (tn != out_f)
    if tiled_n:
        assert out_f % tn == 0, "tn must divide out_features"
    wd_single = (not tiled_n) and wd_single_full

    # ---- batch tiling ---------------------------------------------------------
    if tm is None:
        tm = min(_round_up(B, sublane), tm_cap)
        # Keep >=2 batch tiles when B is big: pipelines the x/out DMAs and feeds
        # both v7x TensorCores (batch axis is the "parallel" one).
        if B >= 128 and pl.cdiv(B, tm) < 2:
            tm = _round_up(pl.cdiv(B, 2), sublane)
        # Shrink to the per-chip VMEM budget.
        while tm > sublane and est(tm, tn, tiled_n, wd_single) > budget:
            tm = max(sublane, _round_up(tm // 2, sublane))
    else:
        assert tm % sublane == 0 or tm >= B, "tm must be sublane-aligned"

    vmem_est = est(tm, tn, tiled_n, wd_single)
    assert vmem_est <= budget, (
        f"tiles do not fit VMEM budget ({vmem_est} > {budget}); "
        "in_features too large — needs a K-tiling path")
    vmem_limit = int(min(max(vmem_est + (4 << 20), 16 << 20), budget))

    we_kw = {"pipeline_mode": pl.Buffered(1)} if we_single else {}
    wd_kw = {"pipeline_mode": pl.Buffered(1)} if wd_single else {}

    cost = pl.CostEstimate(
        flops=int(2 * B * h_dim * (in_f + out_f)),
        transcendentals=0,
        bytes_accessed=int(B * in_f * xb + we_bytes + h_dim * out_f * wb
                           + out_f * 4 + B * out_f * xb),
    )

    if not tiled_n:
        grid = (pl.cdiv(B, tm),)
        grid_spec = pltpu.PrefetchScalarGridSpec(
            num_scalar_prefetch=0,
            grid=grid,
            in_specs=[
                pl.BlockSpec((tm, in_f), lambda i: (i, 0)),              # x tile
                pl.BlockSpec((in_f, h_dim), lambda i: (0, 0), **we_kw),  # We^T
                pl.BlockSpec((h_dim, out_f), lambda i: (0, 0), **wd_kw),  # Wd^T
                pl.BlockSpec((1, out_f), lambda i: (0, 0)),              # bias
            ],
            out_specs=pl.BlockSpec((tm, out_f), lambda i: (i, 0)),
        )
        kernel = _svd_linear_kernel_fused
        dims = ("parallel",)
    else:
        grid = (pl.cdiv(B, tm), out_f // tn)
        grid_spec = pltpu.PrefetchScalarGridSpec(
            num_scalar_prefetch=0,
            grid=grid,
            in_specs=[
                pl.BlockSpec((tm, in_f), lambda i, j: (i, 0)),
                pl.BlockSpec((in_f, h_dim), lambda i, j: (0, 0), **we_kw),
                pl.BlockSpec((h_dim, tn), lambda i, j: (0, j)),
                pl.BlockSpec((1, tn), lambda i, j: (0, j)),
            ],
            out_specs=pl.BlockSpec((tm, tn), lambda i, j: (i, j)),
            scratch_shapes=[pltpu.VMEM((tm, h_dim), h_dtype)],
        )
        kernel = _svd_linear_kernel_tiled_n
        # j MUST stay "arbitrary" (sequential) — h scratch reuse depends on it.
        dims = ("parallel", "arbitrary")

    return pl.pallas_call(
        kernel,
        out_shape=jax.ShapeDtypeStruct((B, out_f), x.dtype),
        grid_spec=grid_spec,
        compiler_params=pltpu.CompilerParams(
            dimension_semantics=dims,
            vmem_limit_bytes=vmem_limit,
        ),
        cost_estimate=cost,
    )(x, we_t, wd_t, b2d)


def reference(x, we, wd, b):
    return (x @ we.T) @ wd.T + b[None, :]


if __name__ == "__main__":
    key = jax.random.PRNGKey(0)
    k_x, k_we, k_wd, k_b, k_x2, k_we2, k_wd2, k_b2 = jax.random.split(key, 8)

    # ---- Test 1: module-scale shapes -> fused 1-D grid path -----------------
    # SVDLinearLayer(in_features=32, out_features=32, h_dim=16, bias=True)
    B, in_features, h_dim, out_features = 8, 32, 16, 32
    x = jax.random.normal(k_x, (B, in_features), dtype=jnp.float32)
    we = jax.random.normal(k_we, (h_dim, in_features), dtype=jnp.float32) * 0.1
    wd = jax.random.normal(k_wd, (out_features, h_dim), dtype=jnp.float32) * 0.1
    b = jax.random.normal(k_b, (out_features,), dtype=jnp.float32) * 0.1

    params = prepare_svd_linear_params(we, wd, b)   # once, at weight-load time
    y = jax.block_until_ready(svd_linear(x, *params))
    y_ref = reference(x, we, wd, b)
    assert y.shape == (B, out_features)
    assert jnp.allclose(y, y_ref, atol=1e-5, rtol=1e-5), "test1 mismatch vs reference"

    # ---- Test 2: ragged batch + tiled-N path (exercises the 2-D kernel) -----
    B2, in2, h2, out2 = 100, 256, 64, 256
    x2 = jax.random.normal(k_x2, (B2, in2), dtype=jnp.float32)
    we2 = jax.random.normal(k_we2, (h2, in2), dtype=jnp.float32) * 0.05
    wd2 = jax.random.normal(k_wd2, (out2, h2), dtype=jnp.float32) * 0.05
    b2 = jax.random.normal(k_b2, (out2,), dtype=jnp.float32) * 0.05

    params2 = prepare_svd_linear_params(we2, wd2, b2)
    y2 = jax.block_until_ready(svd_linear(x2, *params2, tm=64, tn=128))
    y2_ref = reference(x2, we2, wd2, b2)
    assert y2.shape == (B2, out2)
    assert jnp.allclose(y2, y2_ref, atol=5e-4, rtol=5e-4), "test2 mismatch vs reference"

    print("KERNEL_OK")
</pallas_src>

<mosaic_0001>
module attributes {stable_mosaic.version = 11 : i64} {
  func.func @_svd_linear_kernel_fused(%arg0: i32, %arg1: memref<8x32xf32, #tpu.memory_space<vmem>>, %arg2: memref<32x16xf32, #tpu.memory_space<vmem>>, %arg3: memref<16x32xf32, #tpu.memory_space<vmem>>, %arg4: memref<1x32xf32, #tpu.memory_space<vmem>>, %arg5: memref<8x32xf32, #tpu.memory_space<vmem>>) attributes {dimension_semantics = [#tpu.dimension_semantics<parallel>], iteration_bounds = array<i64: 1>, scalar_prefetch = 0 : i64, scratch_operands = 0 : i64, tpu.core_type = #tpu.core_type<tc>, window_params = [{transform_indices = @transform_0, window_bounds = array<i64: 8, 32>}, {pipeline_mode = #tpu.pipeline_mode<synchronous>, transform_indices = @transform_1, window_bounds = array<i64: 32, 16>}, {pipeline_mode = #tpu.pipeline_mode<synchronous>, transform_indices = @transform_2, window_bounds = array<i64: 16, 32>}, {pipeline_mode = #tpu.pipeline_mode<synchronous>, transform_indices = @transform_3, window_bounds = array<i64: 1, 32>}, {transform_indices = @transform_4, window_bounds = array<i64: 8, 32>}]} {
    %c0 = arith.constant 0 : index
    %c0_0 = arith.constant 0 : index
    %0 = vector.load %arg1[%c0, %c0_0] : memref<8x32xf32, #tpu.memory_space<vmem>>, vector<8x32xf32>
    %c0_1 = arith.constant 0 : index
    %c0_2 = arith.constant 0 : index
    %1 = vector.load %arg2[%c0_1, %c0_2] : memref<32x16xf32, #tpu.memory_space<vmem>>, vector<32x16xf32>
    %cst = arith.constant dense<0.000000e+00> : vector<8x16xf32>
    %2 = tpu.matmul %0, %1, %cst {dimension_numbers = #tpu.dot_dimension_numbers<[1], [0], [0], [1], [0, 0, 1, 1], [], []>} : vector<8x32xf32>, vector<32x16xf32>, vector<8x16xf32> -> vector<8x16xf32>
    %c0_3 = arith.constant 0 : index
    %c0_4 = arith.constant 0 : index
    %3 = vector.load %arg3[%c0_3, %c0_4] : memref<16x32xf32, #tpu.memory_space<vmem>>, vector<16x32xf32>
    %cst_5 = arith.constant dense<0.000000e+00> : vector<8x32xf32>
    %4 = tpu.matmul %2, %3, %cst_5 {dimension_numbers = #tpu.dot_dimension_numbers<[1], [0], [0], [1], [0, 0, 1, 1], [], []>} : vector<8x16xf32>, vector<16x32xf32>, vector<8x32xf32> -> vector<8x32xf32>
    %c0_6 = arith.constant 0 : index
    %c0_7 = arith.constant 0 : index
    %5 = vector.load %arg4[%c0_6, %c0_7] : memref<1x32xf32, #tpu.memory_space<vmem>>, vector<1x32xf32>
    %6 = vector.broadcast %5 : vector<1x32xf32> to vector<8x32xf32>
    %7 = arith.addf %4, %6 : vector<8x32xf32>
    %c0_8 = arith.constant 0 : index
    %c0_9 = arith.constant 0 : index
    %8 = vector.load %arg5[%c0_8, %c0_9] : memref<8x32xf32, #tpu.memory_space<vmem>>, vector<8x32xf32>
    tpu.vector_store %arg5[%c0_8, %c0_9], %7 {strides = array<i32>} : memref<8x32xf32, #tpu.memory_space<vmem>>, vector<8x32xf32>,
    return
  }
  func.func @transform_0(%arg0: i32) -> (i32, i32) {
    %c0_i32 = arith.constant 0 : i32
    %c0_i32_0 = arith.constant 0 : i32
    return %arg0, %c0_i32 : i32, i32
  }
  func.func @transform_1(%arg0: i32) -> (i32, i32) {
    %c0_i32 = arith.constant 0 : i32
    %c0_i32_0 = arith.constant 0 : i32
    %c0_i32_1 = arith.constant 0 : i32
    return %c0_i32, %c0_i32_0 : i32, i32
  }
  func.func @transform_2(%arg0: i32) -> (i32, i32) {
    %c0_i32 = arith.constant 0 : i32
    %c0_i32_0 = arith.constant 0 : i32
    %c0_i32_1 = arith.constant 0 : i32
    return %c0_i32, %c0_i32_0 : i32, i32
  }
  func.func @transform_3(%arg0: i32) -> (i32, i32) {
    %c0_i32 = arith.constant 0 : i32
    %c0_i32_0 = arith.constant 0 : i32
    %c0_i32_1 = arith.constant 0 : i32
    return %c0_i32, %c0_i32_0 : i32, i32
  }
  func.func @transform_4(%arg0: i32) -> (i32, i32) {
    %c0_i32 = arith.constant 0 : i32
    %c0_i32_0 = arith.constant 0 : i32
    return %arg0, %c0_i32 : i32, i32
  }
}

</mosaic_0001>

<bundles_post_ra>
// kernel: tpu_custom_call.1
= control target key start
LH: loop header
LB: loop body
LE: loop exit
PB: predicated region body
PF: predicated region fallthrough
CT: control target
= control target key end

     0   :  { %s179_s0 = inlined_call_operand.vmem [shape: f32[8,32], index: 0, kind: input, shape index: {}]   ;;  %s180_s1 = inlined_call_operand.vmem [shape: f32[32,16], index: 1, kind: input, shape index: {}]   ;;  %s181_s2 = inlined_call_operand.vmem [shape: f32[16,32], index: 2, kind: input, shape index: {}]   ;;  %s182_s3 = inlined_call_operand.vmem [shape: f32[1,32], index: 3, kind: input, shape index: {}]   ;;  %s183_s4 = inlined_call_operand.hbm [shape: f32[8,32], index: 4, kind: output, shape index: {}]  }
   0x1   :  { %v22_v0 = vld [vmem:[%s180_s1 + $0x18] sm:$0xff]  ;;  %v21_v1 = vld [vmem:[%s180_s1 + $0x10] sm:$0xff]  ;;  %v48_v2 = vld [vmem:[%s181_s2 + $0x8] sm:$0xff] }
   0x2   :  { %39 = vmatpush.msra.mxu0 %v22_v0  ;;  %v20_v3 = vld [vmem:[%s180_s1 + $0x8] sm:$0xff]  ;;  %71 = vmatpush.msra.mxu1 %v48_v2 }
   0x3   :  { %9 = vsyncpa [#allocation3], 0  ;;  %v19_v4 = vld [vmem:[%s180_s1] sm:$0xff]  ;;  %vm23_vm0 = vcmask 261120   ;;  %vm53_vm1 = vcmask 130048   ;;  %s124_s1 = smov [#allocation2]  }
   0x4   :  { %40 = vmatpush.msra.mxu0 %v21_v1  ;;  %v18_v5 = vld [vmem:[%s179_s0] sm:$0xff]  ;;  %s83_s5 = sshll.u32 %s124_s1, 4  ;;  %s85_s7 = sshll.u32 %s183_s4, 4  ;;  %s84_s5 = int_to_ptr.vmem [resolvable:$true] %s83_s5  ;;  %s86_s7 = int_to_ptr.hbm [resolvable:$true] %s85_s7 }
   0x5   :  { %v47_v6 = vld [vmem:[%s181_s2] sm:$0xff] }
   0x6   :  { %41 = vmatpush.msra.mxu0 %v20_v3  ;;  %72 = vmatpush.msra.mxu1 %v47_v6  ;;  %v97_v8 = vld [vmem:[%s182_s3] ss:$0 sm:$0xff] }
   0x8   :  { %42 = vmatpush.msra.mxu0 %v19_v4 }
   0x9   :  { %94 = vmatmul.msk.f32.vlgmr.msra.gmra.mxu0 %vm23_vm0, %v18_v5 }
  0x86   :  { %v44_v7 = vpop.f32.mrf.mxu0 }
  0x87   :  { %95 = vmatmul.msk.f32.vlgmr.msra.gmra.mxu1 %vm53_vm1, %v44_v7 }
 0x104   :  { %v74_v9 = vpop.f32.mrf.mxu1 }
 0x105   :  { %v75_v10 = vadd.f32 %v97_v8, %v74_v9 }
 0x107   :  { %77 = vst.msk [vmem:[#allocation2] sm:$0xff] %vm23_vm0, %v75_v10 }
 0x108   :  { %88 = dma.vmem_to_hbm [thread:$0]  %s84_s5, 128, %s86_s7, [#allocation3]  }
 0x109   :  { %122 = dma.done.wait [#allocation3], 128  }
 0x10a   :  { %123 = vsyncadd [#allocation3], 4294967168 }
 0x10b   :  { %93 = vsyncpa [#allocation3], 1 }

</bundles_post_ra>
